<compile_context>
chip_gen: v7x
topology: tpu7x:2x2x1
jax: 0.10.0
libtpu: 0.0.40
codegen_flags: <defaults>
</compile_context>

<pallas_src>
import functools
import math

import numpy as np

import jax
import jax.numpy as jnp
from jax.experimental import pallas as pl
from jax.experimental.pallas import tpu as pltpu

BN_EPS = 1e-5


# ----------------------------- Pallas kernel ---------------------------------
def _bottleneck_kernel(x_ref, w1_ref, s1_ref, b1_ref, w2_ref, s2_ref, b2_ref,
                       w3_ref, s3_ref, b3_ref, wd_ref, sd_ref, bd_ref,
                       out_ref, col1_ref, col2_ref, col3_ref, *, K, H, dil2):
    """Whole Bottleneck for one batch element; everything stays in VMEM.

      x_ref        : (1, H, W*Cin)        flattened NHWC image (bf16)
      w*_ref       : (K*W*Cin_l, W*Cout_l) concatenated width-Toeplitz conv matrices
      s*/b*_ref    : (1, W*Cout_l)         folded BN scale / bias (f32), Wo-tiled
      wd/sd/bd     : 1x1 downsample conv + folded BN (bias folded)
      out_ref      : (1, H, W*Cout_l)      f32 output (padded channels are 0)
      col*_ref     : (H, K*W*C_l)          im2col scratch slabs (bf16)
    """

    def im2col(col_ref, src, dil, pad):
        # Column block ky holds the input rows shifted by (ky*dil - pad); rows that
        # fall in the H-padding are zeroed.  All slices are static -> plain copies.
        WCk = src.shape[1]
        for ky in range(K):
            c0 = ky * WCk
            dst0 = max(0, pad - ky * dil)
            dst1 = min(H, H + pad - ky * dil)
            if dst0 > 0:
                col_ref[0:dst0, c0:c0 + WCk] = jnp.zeros((dst0, WCk), col_ref.dtype)
            if dst1 < H:
                col_ref[dst1:H, c0:c0 + WCk] = jnp.zeros((H - dst1, WCk), col_ref.dtype)
            if dst1 > dst0:
                s0 = dst0 + ky * dil - pad
                col_ref[dst0:dst1, c0:c0 + WCk] = src[s0:s0 + (dst1 - dst0), :]

    cdt = col1_ref.dtype
    x = x_ref[0]                                                  # (H, W*Cin)

    # conv1 (3x3, pad 1) + bn1 + relu : one MXU matmul, contraction K*W*Cin
    im2col(col1_ref, x, 1, 1)
    y = jnp.dot(col1_ref[...], w1_ref[...], preferred_element_type=jnp.float32)
    y1 = jnp.maximum(y * s1_ref[...] + b1_ref[...], 0.0).astype(cdt)

    # conv2 (3x3, pad=dil, dilation=dil) + bn2 + relu
    im2col(col2_ref, y1, dil2, dil2)
    y = jnp.dot(col2_ref[...], w2_ref[...], preferred_element_type=jnp.float32)
    y2 = jnp.maximum(y * s2_ref[...] + b2_ref[...], 0.0).astype(cdt)

    # conv3 (3x3, pad 1) + bn3
    im2col(col3_ref, y2, 1, 1)
    y = jnp.dot(col3_ref[...], w3_ref[...], preferred_element_type=jnp.float32)
    y3 = y * s3_ref[...] + b3_ref[...]

    # downsample (1x1 conv + bias + bn) on x, residual add, final relu
    res = jnp.dot(x, wd_ref[...], preferred_element_type=jnp.float32)
    out = jnp.maximum(y3 + res * sd_ref[...] + bd_ref[...], 0.0)
    out_ref[0] = out.astype(out_ref.dtype)


# ----------------------- host-side precompute (runs once) ---------------------
def _fold_bn(bn, conv_bias=None, eps=BN_EPS):
    gamma, beta, mean, var = (np.asarray(p, np.float32) for p in bn)
    s = gamma / np.sqrt(var + eps)
    b = beta - mean * s
    if conv_bias is not None:
        b = b + np.asarray(conv_bias, np.float32) * s
    return s, b


def _conv_toeplitz(w_oihw, W, dil, pad, cin_p, cout_p):
    """OIHW conv weight -> (K*W*cin_p, W*cout_p) width-Toeplitz matrix (stride 1).
    W-padding / dilation folded in; channels zero-padded to the lane-dense counts."""
    w = np.asarray(w_oihw, np.float32)                  # (Cout, Cin, K, Kx)
    cout, cin, K, Kx = w.shape
    m = np.zeros((K, W, cin_p, W, cout_p), np.float32)
    for ky in range(K):
        for kx in range(Kx):
            for wo in range(W):
                wi = wo + kx * dil - pad
                if 0 <= wi < W:
                    m[ky, wi, :cin, wo, :cout] += w[:, :, ky, kx].T
    return m.reshape(K * W * cin_p, W * cout_p)


def _tile_scale_bias(s, b, cout_p, W):
    sp = np.zeros(cout_p, np.float32); sp[:s.shape[0]] = s
    bp = np.zeros(cout_p, np.float32); bp[:b.shape[0]] = b
    return (np.tile(sp, W).reshape(1, W * cout_p),
            np.tile(bp, W).reshape(1, W * cout_p))


def make_bottleneck_forward(params, H, W, *, stride=1, dilation=1,
                            compute_dtype=jnp.bfloat16):
    """Precompute (host, once) the Toeplitz matrices + folded BN; return a jit-able
    forward fn: x (N, Cin, H, W) f32 -> (N, Cout, H, W) f32."""
    if stride != 1:
        # TODO(synk): the module's downsample is stride-1, so stride>1 would make the
        # residual mismatch conv3's output (same inconsistency exists in the PyTorch
        # spec); only stride=1 is implemented.
        raise NotImplementedError("Bottleneck(ResUnet_cls) is only used with stride=1")

    cout1, cin, K, _ = params["w1"].shape
    cout2 = params["w3"].shape[0]
    assert params["w2"].shape[2] == K and params["w3"].shape[2] == K

    # Pad channel counts so every flattened W*C lane width is a multiple of 128
    # (full-lane, unmasked loads/stores).  Padded channels carry zero weight/scale/
    # bias so they are exactly 0 through the whole block.
    lane_mult = max(1, 128 // math.gcd(W, 128))
    rup = lambda c: int(-(-c // lane_mult) * lane_mult)
    cin_p, c1_p, c2_p = rup(cin), rup(cout1), rup(cout2)

    s1, b1 = _fold_bn(params["bn1"])
    s2, b2 = _fold_bn(params["bn2"])
    s3, b3 = _fold_bn(params["bn3"])
    sd, bd = _fold_bn(params["bn_ds"], conv_bias=params["b_ds"])

    cdt = jnp.dtype(compute_dtype)
    consts = dict(
        w1=jnp.asarray(_conv_toeplitz(params["w1"], W, 1, 1, cin_p, c1_p), cdt),
        w2=jnp.asarray(_conv_toeplitz(params["w2"], W, dilation, dilation, c1_p, c2_p), cdt),
        w3=jnp.asarray(_conv_toeplitz(params["w3"], W, 1, 1, c2_p, c2_p), cdt),
        wd=jnp.asarray(_conv_toeplitz(params["w_ds"], W, 1, 0, cin_p, c2_p), cdt),
    )
    for name, s, b, cp in (("1", s1, b1, c1_p), ("2", s2, b2, c2_p),
                           ("3", s3, b3, c2_p), ("d", sd, bd, c2_p)):
        ss, bb = _tile_scale_bias(s, b, cp, W)
        consts["s" + name] = jnp.asarray(ss)
        consts["b" + name] = jnp.asarray(bb)

    cfg = dict(K=int(K), dil=int(dilation), H=int(H), W=int(W), cin=int(cin),
               cin_p=cin_p, c1_p=c1_p, c2_p=c2_p, c_out=int(cout2),
               compute_dtype=cdt)

    def forward(x_nchw):
        return _bottleneck_apply(x_nchw, consts, cfg)

    return forward


# ----------------------------- pallas_call wrapper ----------------------------
def _bottleneck_apply(x_nchw, c, cfg):
    N, cin, H, W = x_nchw.shape
    assert (H, W, cin) == (cfg["H"], cfg["W"], cfg["cin"]), "prepared for another shape"
    K, dil = cfg["K"], cfg["dil"]
    cin_p, c1_p, c2_p = cfg["cin_p"], cfg["c1_p"], cfg["c2_p"]
    cdt = cfg["compute_dtype"]
    WC0, WC1, WC2 = W * cin_p, W * c1_p, W * c2_p

    # NCHW -> NHWC, zero-pad channels to the lane-dense count, flatten (W, C) on lanes.
    x = jnp.transpose(x_nchw, (0, 2, 3, 1))
    if cin_p > cin:
        x = jnp.pad(x, ((0, 0), (0, 0), (0, 0), (0, cin_p - cin)))
    x = x.reshape(N, H, WC0).astype(cdt)

    args = [x, c["w1"], c["s1"], c["b1"], c["w2"], c["s2"], c["b2"],
            c["w3"], c["s3"], c["b3"], c["wd"], c["sd"], c["bd"]]

    def const_spec(a):                       # whole array, same block every step
        return pl.BlockSpec(a.shape, lambda n, nd=a.ndim: (0,) * nd)

    in_specs = [pl.BlockSpec((1, H, WC0), lambda n: (n, 0, 0))]
    in_specs += [const_spec(a) for a in args[1:]]

    kernel = functools.partial(_bottleneck_kernel, K=K, H=H, dil2=dil)

    # Advisory cost estimate + generation-aware VMEM budget.
    cdt_i = jnp.dtype(cdt).itemsize
    flops = 2 * N * H * (K * WC0 * WC1 + K * WC1 * WC2 + K * WC2 * WC2 + WC0 * WC2)
    const_bytes = sum(int(a.size) * a.dtype.itemsize for a in args[1:])
    bytes_accessed = int(x.size) * cdt_i + const_bytes + N * H * WC2 * 4
    vmem_est = (2 * H * WC0 * cdt_i                       # input image, double buffered
                + 2 * const_bytes                         # constant blocks (worst case)
                + K * H * (WC0 + WC1 + WC2) * cdt_i       # im2col scratch slabs
                + 2 * H * WC2 * 4                         # output, double buffered
                + (2 << 20))                              # live f32 values + headroom
    try:
        vmem_cap = int(pltpu.get_tpu_info().vmem_capacity_bytes)
    except Exception:                                     # older/newer jax fallback
        vmem_cap = 64 << 20
    vmem_limit = int(min(max(2 * vmem_est, 16 << 20), (vmem_cap * 3) // 4))

    out = pl.pallas_call(
        kernel,
        out_shape=jax.ShapeDtypeStruct((N, H, WC2), jnp.float32),
        grid=(N,),
        in_specs=in_specs,
        out_specs=pl.BlockSpec((1, H, WC2), lambda n: (n, 0, 0)),
        scratch_shapes=[pltpu.VMEM((H, K * WC0), cdt),
                        pltpu.VMEM((H, K * WC1), cdt),
                        pltpu.VMEM((H, K * WC2), cdt)],
        compiler_params=pltpu.CompilerParams(
            dimension_semantics=("parallel",),
            vmem_limit_bytes=vmem_limit),
        cost_estimate=pl.CostEstimate(flops=int(flops), transcendentals=0,
                                      bytes_accessed=int(bytes_accessed)),
    )(*args)

    out = out.reshape(N, H, W, c2_p)[..., :cfg["c_out"]]    # drop zero-padded channels
    return jnp.transpose(out, (0, 3, 1, 2))                 # NHWC -> NCHW


# ----------------------------- parameters -------------------------------------
def init_params(key, inplanes, planes):
    half = int(planes * 0.5)
    keys = jax.random.split(key, 9)

    def conv_w(k, cout, cin, ksz):
        fan_in = cin * ksz * ksz
        return jax.random.normal(k, (cout, cin, ksz, ksz), jnp.float32) / jnp.sqrt(fan_in)

    def bn_p(k, ch):
        k1, k2, k3, k4 = jax.random.split(k, 4)
        gamma = 1.0 + 0.1 * jax.random.normal(k1, (ch,), jnp.float32)
        beta = 0.1 * jax.random.normal(k2, (ch,), jnp.float32)
        mean = 0.1 * jax.random.normal(k3, (ch,), jnp.float32)
        var = 1.0 + 0.2 * jax.random.uniform(k4, (ch,), jnp.float32)
        return gamma, beta, mean, var

    return dict(
        w1=conv_w(keys[0], planes, inplanes, 3),
        bn1=bn_p(keys[1], planes),
        w2=conv_w(keys[2], half, planes, 3),
        bn2=bn_p(keys[3], half),
        w3=conv_w(keys[4], half, half, 3),
        bn3=bn_p(keys[5], half),
        w_ds=conv_w(keys[6], half, inplanes, 1),
        b_ds=0.1 * jax.random.normal(keys[7], (half,), jnp.float32),
        bn_ds=bn_p(keys[8], half),
    )


# ----------------------------- pure-JAX reference -----------------------------
def _ref_forward(x_nchw, params, *, stride=1, dilation=1, compute_dtype=jnp.float32):
    """Module semantics.  With compute_dtype=bfloat16 the conv inputs are rounded to
    bf16 (f32 accumulate), mirroring the kernel's MXU precision exactly."""
    def conv(x, w, stride=1, padding=0, dilation=1, bias=None):
        xq = x.astype(compute_dtype).astype(jnp.float32)
        wq = w.astype(compute_dtype).astype(jnp.float32)
        y = jax.lax.conv_general_dilated(
            xq, wq, (stride, stride), [(padding, padding)] * 2,
            rhs_dilation=(dilation, dilation),
            dimension_numbers=("NCHW", "OIHW", "NCHW"),
            precision=jax.lax.Precision.HIGHEST)
        if bias is not None:
            y = y + bias[None, :, None, None]
        return y

    def bn(x, p):
        gamma, beta, mean, var = p
        s = gamma / jnp.sqrt(var + BN_EPS)
        return (x - mean[None, :, None, None]) * s[None, :, None, None] + beta[None, :, None, None]

    relu = lambda v: jnp.maximum(v, 0.0)
    out = relu(bn(conv(x_nchw, params["w1"], stride=stride, padding=1), params["bn1"]))
    out = relu(bn(conv(out, params["w2"], padding=dilation, dilation=dilation), params["bn2"]))
    out = bn(conv(out, params["w3"], padding=1), params["bn3"])
    res = bn(conv(x_nchw, params["w_ds"], padding=0, bias=params["b_ds"]), params["bn_ds"])
    return relu(out + res)


if __name__ == "__main__":
    key = jax.random.PRNGKey(0)
    kx_, kp_ = jax.random.split(key)
    inplanes, planes = 4, 8                    # -> int(planes*0.5) = 4 output channels
    N, H, W = 2, 16, 16
    x = jax.random.normal(kx_, (N, inplanes, H, W), jnp.float32)
    params = init_params(kp_, inplanes, planes)

    fwd = jax.jit(make_bottleneck_forward(params, H, W, dilation=1))
    out = jax.block_until_ready(fwd(x))
    assert out.shape == (N, int(planes * 0.5), H, W), out.shape

    # Tight check vs a bf16-faithful reference (same input rounding, f32 accumulate).
    ref_bf16 = jax.block_until_ready(_ref_forward(x, params, compute_dtype=jnp.bfloat16))
    err_tight = float(jnp.max(jnp.abs(out - ref_bf16)))
    assert jnp.allclose(out, ref_bf16, rtol=5e-3, atol=5e-3), err_tight

    # Loose check vs exact f32 module semantics (only bf16 MXU input rounding differs).
    ref_f32 = jax.block_until_ready(_ref_forward(x, params))
    err_loose = float(jnp.max(jnp.abs(out - ref_f32)))
    assert jnp.allclose(out, ref_f32, rtol=5e-2, atol=5e-2), err_loose

    # Also exercise the dilation=2 path of conv2.
    fwd_d2 = jax.jit(make_bottleneck_forward(params, H, W, dilation=2))
    out2 = jax.block_until_ready(fwd_d2(x))
    ref2 = jax.block_until_ready(_ref_forward(x, params, dilation=2, compute_dtype=jnp.bfloat16))
    assert jnp.allclose(out2, ref2, rtol=5e-3, atol=5e-3), float(jnp.max(jnp.abs(out2 - ref2)))

    print("KERNEL_OK")
</pallas_src>

<mosaic_0001>
module attributes {stable_mosaic.version = 11 : i64} {
  func.func @_bottleneck_kernel(%arg0: i32, %arg1: memref<1x16x128xbf16, #tpu.memory_space<vmem>>, %arg2: memref<384x128xbf16, #tpu.memory_space<vmem>>, %arg3: memref<1x128xf32, #tpu.memory_space<vmem>>, %arg4: memref<1x128xf32, #tpu.memory_space<vmem>>, %arg5: memref<384x128xbf16, #tpu.memory_space<vmem>>, %arg6: memref<1x128xf32, #tpu.memory_space<vmem>>, %arg7: memref<1x128xf32, #tpu.memory_space<vmem>>, %arg8: memref<384x128xbf16, #tpu.memory_space<vmem>>, %arg9: memref<1x128xf32, #tpu.memory_space<vmem>>, %arg10: memref<1x128xf32, #tpu.memory_space<vmem>>, %arg11: memref<128x128xbf16, #tpu.memory_space<vmem>>, %arg12: memref<1x128xf32, #tpu.memory_space<vmem>>, %arg13: memref<1x128xf32, #tpu.memory_space<vmem>>, %arg14: memref<1x16x128xf32, #tpu.memory_space<vmem>>, %arg15: memref<16x384xbf16, #tpu.memory_space<vmem>>, %arg16: memref<16x384xbf16, #tpu.memory_space<vmem>>, %arg17: memref<16x384xbf16, #tpu.memory_space<vmem>>) attributes {dimension_semantics = [#tpu.dimension_semantics<parallel>], iteration_bounds = array<i64: 2>, scalar_prefetch = 0 : i64, scratch_operands = 3 : i64, tpu.core_type = #tpu.core_type<tc>, window_params = [{transform_indices = @transform_0, window_bounds = array<i64: 1, 16, 128>}, {pipeline_mode = #tpu.pipeline_mode<synchronous>, transform_indices = @transform_1, window_bounds = array<i64: 384, 128>}, {pipeline_mode = #tpu.pipeline_mode<synchronous>, transform_indices = @transform_2, window_bounds = array<i64: 1, 128>}, {pipeline_mode = #tpu.pipeline_mode<synchronous>, transform_indices = @transform_3, window_bounds = array<i64: 1, 128>}, {pipeline_mode = #tpu.pipeline_mode<synchronous>, transform_indices = @transform_4, window_bounds = array<i64: 384, 128>}, {pipeline_mode = #tpu.pipeline_mode<synchronous>, transform_indices = @transform_5, window_bounds = array<i64: 1, 128>}, {pipeline_mode = #tpu.pipeline_mode<synchronous>, transform_indices = @transform_6, window_bounds = array<i64: 1, 128>}, {pipeline_mode = #tpu.pipeline_mode<synchronous>, transform_indices = @transform_7, window_bounds = array<i64: 384, 128>}, {pipeline_mode = #tpu.pipeline_mode<synchronous>, transform_indices = @transform_8, window_bounds = array<i64: 1, 128>}, {pipeline_mode = #tpu.pipeline_mode<synchronous>, transform_indices = @transform_9, window_bounds = array<i64: 1, 128>}, {pipeline_mode = #tpu.pipeline_mode<synchronous>, transform_indices = @transform_10, window_bounds = array<i64: 128, 128>}, {pipeline_mode = #tpu.pipeline_mode<synchronous>, transform_indices = @transform_11, window_bounds = array<i64: 1, 128>}, {pipeline_mode = #tpu.pipeline_mode<synchronous>, transform_indices = @transform_12, window_bounds = array<i64: 1, 128>}, {transform_indices = @transform_13, window_bounds = array<i64: 1, 16, 128>}]} {
    %c0 = arith.constant 0 : index
    %c0_0 = arith.constant 0 : index
    %c0_1 = arith.constant 0 : index
    %0 = vector.load %arg1[%c0, %c0_0, %c0_1] : memref<1x16x128xbf16, #tpu.memory_space<vmem>>, vector<1x16x128xbf16>
    %1 = vector.shape_cast %0 : vector<1x16x128xbf16> to vector<16x128xbf16>
    %cst = arith.constant 0.000000e+00 : bf16
    %2 = vector.broadcast %cst : bf16 to vector<1x128xbf16>
    %c0_2 = arith.constant 0 : index
    %c0_3 = arith.constant 0 : index
    %3 = vector.load %arg15[%c0_2, %c0_3] : memref<16x384xbf16, #tpu.memory_space<vmem>>, vector<1x128xbf16>
    tpu.vector_store %arg15[%c0_2, %c0_3], %2 {strides = array<i32>} : memref<16x384xbf16, #tpu.memory_space<vmem>>, vector<1x128xbf16>,
    %4 = vector.extract_strided_slice %1 {offsets = [0, 0], sizes = [15, 128], strides = [1, 1]} : vector<16x128xbf16> to vector<15x128xbf16>
    %c1 = arith.constant 1 : index
    %c0_4 = arith.constant 0 : index
    %5 = vector.load %arg15[%c1, %c0_4] : memref<16x384xbf16, #tpu.memory_space<vmem>>, vector<15x128xbf16>
    tpu.vector_store %arg15[%c1, %c0_4], %4 {strides = array<i32>} : memref<16x384xbf16, #tpu.memory_space<vmem>>, vector<15x128xbf16>,
    %c0_5 = arith.constant 0 : index
    %c128 = arith.constant 128 : index
    %6 = vector.load %arg15[%c0_5, %c128] : memref<16x384xbf16, #tpu.memory_space<vmem>>, vector<16x128xbf16>
    tpu.vector_store %arg15[%c0_5, %c128], %1 {strides = array<i32>} : memref<16x384xbf16, #tpu.memory_space<vmem>>, vector<16x128xbf16>,
    %cst_6 = arith.constant 0.000000e+00 : bf16
    %7 = vector.broadcast %cst_6 : bf16 to vector<1x128xbf16>
    %c15 = arith.constant 15 : index
    %c256 = arith.constant 256 : index
    %8 = vector.load %arg15[%c15, %c256] : memref<16x384xbf16, #tpu.memory_space<vmem>>, vector<1x128xbf16>
    tpu.vector_store %arg15[%c15, %c256], %7 {strides = array<i32>} : memref<16x384xbf16, #tpu.memory_space<vmem>>, vector<1x128xbf16>,
    %9 = vector.extract_strided_slice %1 {offsets = [1, 0], sizes = [15, 128], strides = [1, 1]} : vector<16x128xbf16> to vector<15x128xbf16>
    %c0_7 = arith.constant 0 : index
    %c256_8 = arith.constant 256 : index
    %10 = vector.load %arg15[%c0_7, %c256_8] : memref<16x384xbf16, #tpu.memory_space<vmem>>, vector<15x128xbf16>
    tpu.vector_store %arg15[%c0_7, %c256_8], %9 {strides = array<i32>} : memref<16x384xbf16, #tpu.memory_space<vmem>>, vector<15x128xbf16>,
    %c0_9 = arith.constant 0 : index
    %c0_10 = arith.constant 0 : index
    %11 = vector.load %arg15[%c0_9, %c0_10] : memref<16x384xbf16, #tpu.memory_space<vmem>>, vector<16x384xbf16>
    %c0_11 = arith.constant 0 : index
    %c0_12 = arith.constant 0 : index
    %12 = vector.load %arg2[%c0_11, %c0_12] : memref<384x128xbf16, #tpu.memory_space<vmem>>, vector<384x128xbf16>
    %cst_13 = arith.constant dense<0.000000e+00> : vector<16x128xf32>
    %13 = tpu.matmul %11, %12, %cst_13 {dimension_numbers = #tpu.dot_dimension_numbers<[1], [0], [0], [1], [0, 0, 1, 1], [], []>} : vector<16x384xbf16>, vector<384x128xbf16>, vector<16x128xf32> -> vector<16x128xf32>
    %c0_14 = arith.constant 0 : index
    %c0_15 = arith.constant 0 : index
    %14 = vector.load %arg3[%c0_14, %c0_15] : memref<1x128xf32, #tpu.memory_space<vmem>>, vector<1x128xf32>
    %15 = vector.broadcast %14 : vector<1x128xf32> to vector<16x128xf32>
    %16 = arith.mulf %13, %15 : vector<16x128xf32>
    %c0_16 = arith.constant 0 : index
    %c0_17 = arith.constant 0 : index
    %17 = vector.load %arg4[%c0_16, %c0_17] : memref<1x128xf32, #tpu.memory_space<vmem>>, vector<1x128xf32>
    %18 = vector.broadcast %17 : vector<1x128xf32> to vector<16x128xf32>
    %19 = arith.addf %16, %18 : vector<16x128xf32>
    %cst_18 = arith.constant 0.000000e+00 : f32
    %20 = vector.broadcast %cst_18 : f32 to vector<16x128xf32>
    %21 = arith.maximumf %19, %20 : vector<16x128xf32>
    %22 = arith.truncf %21 : vector<16x128xf32> to vector<16x128xbf16>
    %cst_19 = arith.constant 0.000000e+00 : bf16
    %23 = vector.broadcast %cst_19 : bf16 to vector<1x128xbf16>
    %c0_20 = arith.constant 0 : index
    %c0_21 = arith.constant 0 : index
    %24 = vector.load %arg16[%c0_20, %c0_21] : memref<16x384xbf16, #tpu.memory_space<vmem>>, vector<1x128xbf16>
    tpu.vector_store %arg16[%c0_20, %c0_21], %23 {strides = array<i32>} : memref<16x384xbf16, #tpu.memory_space<vmem>>, vector<1x128xbf16>,
    %25 = vector.extract_strided_slice %22 {offsets = [0, 0], sizes = [15, 128], strides = [1, 1]} : vector<16x128xbf16> to vector<15x128xbf16>
    %c1_22 = arith.constant 1 : index
    %c0_23 = arith.constant 0 : index
    %26 = vector.load %arg16[%c1_22, %c0_23] : memref<16x384xbf16, #tpu.memory_space<vmem>>, vector<15x128xbf16>
    tpu.vector_store %arg16[%c1_22, %c0_23], %25 {strides = array<i32>} : memref<16x384xbf16, #tpu.memory_space<vmem>>, vector<15x128xbf16>,
    %c0_24 = arith.constant 0 : index
    %c128_25 = arith.constant 128 : index
    %27 = vector.load %arg16[%c0_24, %c128_25] : memref<16x384xbf16, #tpu.memory_space<vmem>>, vector<16x128xbf16>
    tpu.vector_store %arg16[%c0_24, %c128_25], %22 {strides = array<i32>} : memref<16x384xbf16, #tpu.memory_space<vmem>>, vector<16x128xbf16>,
    %cst_26 = arith.constant 0.000000e+00 : bf16
    %28 = vector.broadcast %cst_26 : bf16 to vector<1x128xbf16>
    %c15_27 = arith.constant 15 : index
    %c256_28 = arith.constant 256 : index
    %29 = vector.load %arg16[%c15_27, %c256_28] : memref<16x384xbf16, #tpu.memory_space<vmem>>, vector<1x128xbf16>
    tpu.vector_store %arg16[%c15_27, %c256_28], %28 {strides = array<i32>} : memref<16x384xbf16, #tpu.memory_space<vmem>>, vector<1x128xbf16>,
    %30 = vector.extract_strided_slice %22 {offsets = [1, 0], sizes = [15, 128], strides = [1, 1]} : vector<16x128xbf16> to vector<15x128xbf16>
    %c0_29 = arith.constant 0 : index
    %c256_30 = arith.constant 256 : index
    %31 = vector.load %arg16[%c0_29, %c256_30] : memref<16x384xbf16, #tpu.memory_space<vmem>>, vector<15x128xbf16>
    tpu.vector_store %arg16[%c0_29, %c256_30], %30 {strides = array<i32>} : memref<16x384xbf16, #tpu.memory_space<vmem>>, vector<15x128xbf16>,
    %c0_31 = arith.constant 0 : index
    %c0_32 = arith.constant 0 : index
    %32 = vector.load %arg16[%c0_31, %c0_32] : memref<16x384xbf16, #tpu.memory_space<vmem>>, vector<16x384xbf16>
    %c0_33 = arith.constant 0 : index
    %c0_34 = arith.constant 0 : index
    %33 = vector.load %arg5[%c0_33, %c0_34] : memref<384x128xbf16, #tpu.memory_space<vmem>>, vector<384x128xbf16>
    %cst_35 = arith.constant dense<0.000000e+00> : vector<16x128xf32>
    %34 = tpu.matmul %32, %33, %cst_35 {dimension_numbers = #tpu.dot_dimension_numbers<[1], [0], [0], [1], [0, 0, 1, 1], [], []>} : vector<16x384xbf16>, vector<384x128xbf16>, vector<16x128xf32> -> vector<16x128xf32>
    %c0_36 = arith.constant 0 : index
    %c0_37 = arith.constant 0 : index
    %35 = vector.load %arg6[%c0_36, %c0_37] : memref<1x128xf32, #tpu.memory_space<vmem>>, vector<1x128xf32>
    %36 = vector.broadcast %35 : vector<1x128xf32> to vector<16x128xf32>
    %37 = arith.mulf %34, %36 : vector<16x128xf32>
    %c0_38 = arith.constant 0 : index
    %c0_39 = arith.constant 0 : index
    %38 = vector.load %arg7[%c0_38, %c0_39] : memref<1x128xf32, #tpu.memory_space<vmem>>, vector<1x128xf32>
    %39 = vector.broadcast %38 : vector<1x128xf32> to vector<16x128xf32>
    %40 = arith.addf %37, %39 : vector<16x128xf32>
    %cst_40 = arith.constant 0.000000e+00 : f32
    %41 = vector.broadcast %cst_40 : f32 to vector<16x128xf32>
    %42 = arith.maximumf %40, %41 : vector<16x128xf32>
    %43 = arith.truncf %42 : vector<16x128xf32> to vector<16x128xbf16>
    %cst_41 = arith.constant 0.000000e+00 : bf16
    %44 = vector.broadcast %cst_41 : bf16 to vector<1x128xbf16>
    %c0_42 = arith.constant 0 : index
    %c0_43 = arith.constant 0 : index
    %45 = vector.load %arg17[%c0_42, %c0_43] : memref<16x384xbf16, #tpu.memory_space<vmem>>, vector<1x128xbf16>
    tpu.vector_store %arg17[%c0_42, %c0_43], %44 {strides = array<i32>} : memref<16x384xbf16, #tpu.memory_space<vmem>>, vector<1x128xbf16>,
    %46 = vector.extract_strided_slice %43 {offsets = [0, 0], sizes = [15, 128], strides = [1, 1]} : vector<16x128xbf16> to vector<15x128xbf16>
    %c1_44 = arith.constant 1 : index
    %c0_45 = arith.constant 0 : index
    %47 = vector.load %arg17[%c1_44, %c0_45] : memref<16x384xbf16, #tpu.memory_space<vmem>>, vector<15x128xbf16>
    tpu.vector_store %arg17[%c1_44, %c0_45], %46 {strides = array<i32>} : memref<16x384xbf16, #tpu.memory_space<vmem>>, vector<15x128xbf16>,
    %c0_46 = arith.constant 0 : index
    %c128_47 = arith.constant 128 : index
    %48 = vector.load %arg17[%c0_46, %c128_47] : memref<16x384xbf16, #tpu.memory_space<vmem>>, vector<16x128xbf16>
    tpu.vector_store %arg17[%c0_46, %c128_47], %43 {strides = array<i32>} : memref<16x384xbf16, #tpu.memory_space<vmem>>, vector<16x128xbf16>,
    %cst_48 = arith.constant 0.000000e+00 : bf16
    %49 = vector.broadcast %cst_48 : bf16 to vector<1x128xbf16>
    %c15_49 = arith.constant 15 : index
    %c256_50 = arith.constant 256 : index
    %50 = vector.load %arg17[%c15_49, %c256_50] : memref<16x384xbf16, #tpu.memory_space<vmem>>, vector<1x128xbf16>
    tpu.vector_store %arg17[%c15_49, %c256_50], %49 {strides = array<i32>} : memref<16x384xbf16, #tpu.memory_space<vmem>>, vector<1x128xbf16>,
    %51 = vector.extract_strided_slice %43 {offsets = [1, 0], sizes = [15, 128], strides = [1, 1]} : vector<16x128xbf16> to vector<15x128xbf16>
    %c0_51 = arith.constant 0 : index
    %c256_52 = arith.constant 256 : index
    %52 = vector.load %arg17[%c0_51, %c256_52] : memref<16x384xbf16, #tpu.memory_space<vmem>>, vector<15x128xbf16>
    tpu.vector_store %arg17[%c0_51, %c256_52], %51 {strides = array<i32>} : memref<16x384xbf16, #tpu.memory_space<vmem>>, vector<15x128xbf16>,
    %c0_53 = arith.constant 0 : index
    %c0_54 = arith.constant 0 : index
    %53 = vector.load %arg17[%c0_53, %c0_54] : memref<16x384xbf16, #tpu.memory_space<vmem>>, vector<16x384xbf16>
    %c0_55 = arith.constant 0 : index
    %c0_56 = arith.constant 0 : index
    %54 = vector.load %arg8[%c0_55, %c0_56] : memref<384x128xbf16, #tpu.memory_space<vmem>>, vector<384x128xbf16>
    %cst_57 = arith.constant dense<0.000000e+00> : vector<16x128xf32>
    %55 = tpu.matmul %53, %54, %cst_57 {dimension_numbers = #tpu.dot_dimension_numbers<[1], [0], [0], [1], [0, 0, 1, 1], [], []>} : vector<16x384xbf16>, vector<384x128xbf16>, vector<16x128xf32> -> vector<16x128xf32>
    %c0_58 = arith.constant 0 : index
    %c0_59 = arith.constant 0 : index
    %56 = vector.load %arg9[%c0_58, %c0_59] : memref<1x128xf32, #tpu.memory_space<vmem>>, vector<1x128xf32>
    %57 = vector.broadcast %56 : vector<1x128xf32> to vector<16x128xf32>
    %58 = arith.mulf %55, %57 : vector<16x128xf32>
    %c0_60 = arith.constant 0 : index
    %c0_61 = arith.constant 0 : index
    %59 = vector.load %arg10[%c0_60, %c0_61] : memref<1x128xf32, #tpu.memory_space<vmem>>, vector<1x128xf32>
    %60 = vector.broadcast %59 : vector<1x128xf32> to vector<16x128xf32>
    %61 = arith.addf %58, %60 : vector<16x128xf32>
    %c0_62 = arith.constant 0 : index
    %c0_63 = arith.constant 0 : index
    %62 = vector.load %arg11[%c0_62, %c0_63] : memref<128x128xbf16, #tpu.memory_space<vmem>>, vector<128x128xbf16>
    %cst_64 = arith.constant dense<0.000000e+00> : vector<16x128xf32>
    %63 = tpu.matmul %1, %62, %cst_64 {dimension_numbers = #tpu.dot_dimension_numbers<[1], [0], [0], [1], [0, 0, 1, 1], [], []>} : vector<16x128xbf16>, vector<128x128xbf16>, vector<16x128xf32> -> vector<16x128xf32>
    %c0_65 = arith.constant 0 : index
    %c0_66 = arith.constant 0 : index
    %64 = vector.load %arg12[%c0_65, %c0_66] : memref<1x128xf32, #tpu.memory_space<vmem>>, vector<1x128xf32>
    %65 = vector.broadcast %64 : vector<1x128xf32> to vector<16x128xf32>
    %66 = arith.mulf %63, %65 : vector<16x128xf32>
    %67 = arith.addf %61, %66 : vector<16x128xf32>
    %c0_67 = arith.constant 0 : index
    %c0_68 = arith.constant 0 : index
    %68 = vector.load %arg13[%c0_67, %c0_68] : memref<1x128xf32, #tpu.memory_space<vmem>>, vector<1x128xf32>
    %69 = vector.broadcast %68 : vector<1x128xf32> to vector<16x128xf32>
    %70 = arith.addf %67, %69 : vector<16x128xf32>
    %cst_69 = arith.constant 0.000000e+00 : f32
    %71 = vector.broadcast %cst_69 : f32 to vector<16x128xf32>
    %72 = arith.maximumf %70, %71 : vector<16x128xf32>
    %c0_70 = arith.constant 0 : index
    %c0_71 = arith.constant 0 : index
    %c0_72 = arith.constant 0 : index
    %73 = vector.load %arg14[%c0_70, %c0_71, %c0_72] : memref<1x16x128xf32, #tpu.memory_space<vmem>>, vector<1x16x128xf32>
    %74 = vector.shape_cast %73 : vector<1x16x128xf32> to vector<16x128xf32>
    %75 = vector.shape_cast %72 : vector<16x128xf32> to vector<1x16x128xf32>
    tpu.vector_store %arg14[%c0_70, %c0_71, %c0_72], %75 {strides = array<i32>} : memref<1x16x128xf32, #tpu.memory_space<vmem>>, vector<1x16x128xf32>,
    return
  }
  func.func @transform_0(%arg0: i32) -> (i32, i32, i32) {
    %c0_i32 = arith.constant 0 : i32
    %c0_i32_0 = arith.constant 0 : i32
    %c0_i32_1 = arith.constant 0 : i32
    return %arg0, %c0_i32, %c0_i32_0 : i32, i32, i32
  }
  func.func @transform_1(%arg0: i32) -> (i32, i32) {
    %c0_i32 = arith.constant 0 : i32
    %c0_i32_0 = arith.constant 0 : i32
    %c0_i32_1 = arith.constant 0 : i32
    return %c0_i32, %c0_i32_0 : i32, i32
  }
  func.func @transform_2(%arg0: i32) -> (i32, i32) {
    %c0_i32 = arith.constant 0 : i32
    %c0_i32_0 = arith.constant 0 : i32
    %c0_i32_1 = arith.constant 0 : i32
    return %c0_i32, %c0_i32_0 : i32, i32
  }
  func.func @transform_3(%arg0: i32) -> (i32, i32) {
    %c0_i32 = arith.constant 0 : i32
    %c0_i32_0 = arith.constant 0 : i32
    %c0_i32_1 = arith.constant 0 : i32
    return %c0_i32, %c0_i32_0 : i32, i32
  }
  func.func @transform_4(%arg0: i32) -> (i32, i32) {
    %c0_i32 = arith.constant 0 : i32
    %c0_i32_0 = arith.constant 0 : i32
    %c0_i32_1 = arith.constant 0 : i32
    return %c0_i32, %c0_i32_0 : i32, i32
  }
  func.func @transform_5(%arg0: i32) -> (i32, i32) {
    %c0_i32 = arith.constant 0 : i32
    %c0_i32_0 = arith.constant 0 : i32
    %c0_i32_1 = arith.constant 0 : i32
    return %c0_i32, %c0_i32_0 : i32, i32
  }
  func.func @transform_6(%arg0: i32) -> (i32, i32) {
    %c0_i32 = arith.constant 0 : i32
    %c0_i32_0 = arith.constant 0 : i32
    %c0_i32_1 = arith.constant 0 : i32
    return %c0_i32, %c0_i32_0 : i32, i32
  }
  func.func @transform_7(%arg0: i32) -> (i32, i32) {
    %c0_i32 = arith.constant 0 : i32
    %c0_i32_0 = arith.constant 0 : i32
    %c0_i32_1 = arith.constant 0 : i32
    return %c0_i32, %c0_i32_0 : i32, i32
  }
  func.func @transform_8(%arg0: i32) -> (i32, i32) {
    %c0_i32 = arith.constant 0 : i32
    %c0_i32_0 = arith.constant 0 : i32
    %c0_i32_1 = arith.constant 0 : i32
    return %c0_i32, %c0_i32_0 : i32, i32
  }
  func.func @transform_9(%arg0: i32) -> (i32, i32) {
    %c0_i32 = arith.constant 0 : i32
    %c0_i32_0 = arith.constant 0 : i32
    %c0_i32_1 = arith.constant 0 : i32
    return %c0_i32, %c0_i32_0 : i32, i32
  }
  func.func @transform_10(%arg0: i32) -> (i32, i32) {
    %c0_i32 = arith.constant 0 : i32
    %c0_i32_0 = arith.constant 0 : i32
    %c0_i32_1 = arith.constant 0 : i32
    return %c0_i32, %c0_i32_0 : i32, i32
  }
  func.func @transform_11(%arg0: i32) -> (i32, i32) {
    %c0_i32 = arith.constant 0 : i32
    %c0_i32_0 = arith.constant 0 : i32
    %c0_i32_1 = arith.constant 0 : i32
    return %c0_i32, %c0_i32_0 : i32, i32
  }
  func.func @transform_12(%arg0: i32) -> (i32, i32) {
    %c0_i32 = arith.constant 0 : i32
    %c0_i32_0 = arith.constant 0 : i32
    %c0_i32_1 = arith.constant 0 : i32
    return %c0_i32, %c0_i32_0 : i32, i32
  }
  func.func @transform_13(%arg0: i32) -> (i32, i32, i32) {
    %c0_i32 = arith.constant 0 : i32
    %c0_i32_0 = arith.constant 0 : i32
    %c0_i32_1 = arith.constant 0 : i32
    return %arg0, %c0_i32, %c0_i32_0 : i32, i32, i32
  }
}

</mosaic_0001>

<bundles_post_ra>
// kernel: forward.1
= control target key start
LH: loop header
LB: loop body
LE: loop exit
PB: predicated region body
PF: predicated region fallthrough
CT: control target
= control target key end

     0   :  { %s2063_s25 = smov 0   ;;  %s2442_s0 = inlined_call_operand.vmem [shape: bf16[2,16,128], index: 0, kind: input, shape index: {}]   ;;  %s2443_s1 = inlined_call_operand.vmem [shape: bf16[384,128], index: 1, kind: input, shape index: {}]   ;;  %s2444_s2 = inlined_call_operand.vmem [shape: f32[1,128], index: 2, kind: input, shape index: {}]   ;;  %s2445_s3 = inlined_call_operand.vmem [shape: f32[1,128], index: 3, kind: input, shape index: {}]   ;;  %s2446_s4 = inlined_call_operand.vmem [shape: bf16[384,128], index: 4, kind: input, shape index: {}]   ;;  %s2447_s5 = inlined_call_operand.vmem [shape: f32[1,128], index: 5, kind: input, shape index: {}]   ;;  %s2448_s6 = inlined_call_operand.vmem [shape: f32[1,128], index: 6, kind: input, shape index: {}]   ;;  %s2449_s7 = inlined_call_operand.vmem [shape: bf16[384,128], index: 7, kind: input, shape index: {}]   ;;  %s2450_s8 = inlined_call_operand.vmem [shape: f32[1,128], index: 8, kind: input, shape index: {}]   ;;  %s2451_s9 = inlined_call_operand.vmem [shape: f32[1,128], index: 9, kind: input, shape index: {}]   ;;  %s2452_s10 = inlined_call_operand.vmem [shape: bf16[128,128], index: 10, kind: input, shape index: {}]   ;;  %s2453_s11 = inlined_call_operand.vmem [shape: f32[1,128], index: 11, kind: input, shape index: {}]   ;;  %s2454_s12 = inlined_call_operand.vmem [shape: f32[1,128], index: 12, kind: input, shape index: {}]   ;;  %s2455_s13 = inlined_call_operand.vmem [shape: f32[2,16,128], index: 13, kind: output, shape index: {}]  }
   0x1 LB: > { %s1608_s26 = sadd.s32 4294967295, %s1989_s25   ;;  %p1612_p0 = scmp.ge.s32.totalorder %s1989_s25, 1  ;;  %s1989_s25 = sphi %s2063_s25, %s23_s25  }
   0x2   : > { %p387_p1 = scmp.lt.s32.totalorder %s1989_s25, 3 }
   0x4   : > { %p388_p2 = pnand %p1612_p0, %p387_p1 }
   0x5   : > { %v1902_v0 = vld [vmem:[%s2443_s1 + $0x40] sm:$0xff] (!%p388_p2)   ;;  %v1991_v1 = vmov (!%p388_p2), 0.0   ;;  %v1905_v4 = vld [vmem:[%s2443_s1 + $0x48] sm:$0xff] (!%p388_p2)   ;;  %vm1992_vm0 = vmmov (!%p388_p2), 0   ;;  %v1908_v7 = vld [vmem:[%s2443_s1 + $0x50] sm:$0xff] (!%p388_p2)   ;;  %p431_p3 = scmp.lt.s32.totalorder (!%p388_p2), %s1608_s26, 1 }
   0x6   : > { %391 = sbr.rel (%p388_p2) target bundleno = 761 (0x2f9), region = 72  ;;  %1812 = vmatprep.subr.bf16.mxu1 (!%p388_p2), %v1991_v1  ;;  %v1903_v2 = vld [vmem:[%s2443_s1] sm:$0xff] (!%p388_p2)   ;;  %1710 = vmatprep.subr.bf16.mxu0 (!%p388_p2), %v1902_v0  ;;  %v1906_v5 = vld [vmem:[%s2443_s1 + $0x8] sm:$0xff] (!%p388_p2)   ;;  %v1909_v8 = vld [vmem:[%s2443_s1 + $0x10] sm:$0xff] (!%p388_p2)   ;;  %vm444_vm1 = vcmask (!%p388_p2), 1040384   ;;  %vm463_vm2 = vcmask (!%p388_p2), 1047552  }
   0x7   : > { %v1904_v3 = vld [vmem:[%s2443_s1 + $0x80] sm:$0xff] (!%p388_p2)   ;;  %1711 = vmatpush3.bf16.msra.mxu0 (!%p388_p2), %v1903_v2  ;;  %1828 = vmatprep.mubr.msk.bf16.mxu1 (!%p388_p2), %vm1992_vm0, %v1991_v1  ;;  %v1907_v6 = vld [vmem:[%s2443_s1 + $0x88] sm:$0xff] (!%p388_p2)   ;;  %v1910_v9 = vld [vmem:[%s2443_s1 + $0x90] sm:$0xff] (!%p388_p2)   ;;  %vm471_vm3 = vcmask (!%p388_p2), 1047559   ;;  %vm445_vm4 = vsmask.f32 (!%p388_p2), 256 }
   0x8   : > { %1813 = vmatpush3.bf16.msra.mxu1 (!%p388_p2), %v1904_v3  ;;  %1712 = vmatprep.subr.bf16.mxu0 (!%p388_p2), %v1905_v4  ;;  %v1911_v10 = vld [vmem:[%s2443_s1 + $0x58] sm:$0xff] (!%p388_p2)   ;;  %v1914_v13 = vld [vmem:[%s2443_s1 + $0x60] sm:$0xff] (!%p388_p2)   ;;  %v1917_v16 = vld [vmem:[%s2443_s1 + $0x68] sm:$0xff] (!%p388_p2)   ;;  %vm464_vm5 = vsmask.f32 (!%p388_p2), 7938 }
   0x9   : > { %1814 = vmatprep.subr.bf16.mxu1 (!%p388_p2), %v1991_v1  ;;  %v1912_v11 = vld [vmem:[%s2443_s1 + $0x18] sm:$0xff] (!%p388_p2)   ;;  %v1915_v14 = vld [vmem:[%s2443_s1 + $0x20] sm:$0xff] (!%p388_p2)   ;;  %v1918_v17 = vld [vmem:[%s2443_s1 + $0x28] sm:$0xff] (!%p388_p2)   ;;  %vm472_vm7 = vsmask.f32 (!%p388_p2), 7966 }
   0xa   : > { %v1913_v12 = vld [vmem:[%s2443_s1 + $0x98] sm:$0xff] (!%p388_p2)   ;;  %v1916_v15 = vld [vmem:[%s2443_s1 + $0xa0] sm:$0xff] (!%p388_p2)   ;;  %v1919_v18 = vld [vmem:[%s2443_s1 + $0xa8] sm:$0xff] (!%p388_p2)   ;;  %vm480_vm9 = vsmask.f32 (!%p388_p2), 7424 }
   0xb   : > { %1713 = vmatpush3.bf16.msra.mxu0 (!%p388_p2), %v1906_v5  ;;  %v1920_v19 = vld [vmem:[%s2443_s1 + $0x70] sm:$0xff] (!%p388_p2)   ;;  %v1923_v22 = vld [vmem:[%s2443_s1 + $0x78] sm:$0xff] (!%p388_p2)   ;;  %v447_v25 = vld [vmem:[#allocation2] sm:$0x1] (!%p388_p2) }
   0xc   : > { %1815 = vmatpush3.bf16.msra.mxu1 (!%p388_p2), %v1907_v6  ;;  %1714 = vmatprep.subr.bf16.mxu0 (!%p388_p2), %v1908_v7  ;;  %v1921_v20 = vld [vmem:[%s2443_s1 + $0x30] sm:$0xff] (!%p388_p2)   ;;  %v1924_v24 = vld [vmem:[%s2443_s1 + $0x38] sm:$0xff] (!%p388_p2)   ;;  %vm2166_vm6 = vmand (!%p388_p2), %vm444_vm1, %vm445_vm4 }
   0xd   : > { %1816 = vmatprep.subr.bf16.mxu1 %v1991_v1  ;;  %s2465_s26 = smov (!%p431_p3, %s1608_s26), 1  ;;  %v1922_v21 = vld [vmem:[%s2443_s1 + $0xb0] sm:$0xff]   ;;  %v1925_v26 = vld [vmem:[%s2443_s1 + $0xb8] sm:$0xff]   ;;  %v448_v31 = vsel %vm2166_vm6, 0, %v447_v25  ;;  %vm2175_vm8 = vmand %vm463_vm2, %vm464_vm5 }
   0xe   : > { %s1708_s14 = sshll.u32 %s2465_s26, 3  ;;  %v474_v30 = vld [vmem:[#allocation2 + $0x10] sm:$0x80]  ;;  %v1927_v33 = vld [vmem:[%s2446_s4 + $0x40] sm:$0xff]   ;;  %449 = vst [vmem:[#allocation2] sm:$0x1] %v448_v31  ;;  %vm2183_vm10 = vmand %vm471_vm3, %vm472_vm7 }
   0xf   : > { %1715 = vmatpush3.bf16.msra.mxu0 %v1909_v8  ;;  %s435_s23 = scalar_lea.vmem %s2442_s0, %s1708_s14  ;;  %v475_v36 = vsel %vm2183_vm10, 0, %v474_v30  ;;  %vm2191_vm11 = vmand %vm463_vm2, %vm480_vm9  ;;  %v1928_v45 = vld [vmem:[%s2446_s4] sm:$0xff]   ;;  %v1930_v47 = vld [vmem:[%s2446_s4 + $0x48] sm:$0xff]   ;;  %s1709_s27 = sshll.u32 %s2465_s26, 4 }
  0x10   : > { %1817 = vmatpush3.bf16.msra.mxu1 %v1910_v9  ;;  %1716 = vmatprep.subr.bf16.mxu0 %v1911_v10  ;;  %v2155_v23 = vld [vmem:[%s435_s23] sm:$0xff]   ;;  %476 = vst [vmem:[#allocation2 + $0x10] sm:$0x80] %v475_v36  ;;  %v1931_v48 = vld [vmem:[%s2446_s4 + $0x8] sm:$0xff]   ;;  %v1933_v50 = vld [vmem:[%s2446_s4 + $0x50] sm:$0xff]   ;;  %s440_s30 = scalar_lea.vmem %s2455_s13, %s1709_s27 }
  0x11   : > { %1818 = vmatprep.subr.bf16.mxu1 %v1991_v1  ;;  %712 = vmatprep.mubr.bf16.mxu0 %v2155_v23  ;;  %v456_v28 = vshrl.u32 %v2155_v23, 16  ;;  %v459_v29 = vshll.u32 %v2155_v23, 16  ;;  %v1929_v46 = vld [vmem:[%s2446_s4 + $0x80] sm:$0xff]   ;;  %v1932_v49 = vld [vmem:[%s2446_s4 + $0x88] sm:$0xff]   ;;  %v1934_v51 = vld [vmem:[%s2446_s4 + $0x10] sm:$0xff]  }
  0x12   : > { %v1935_v52 = vld [vmem:[%s2446_s4 + $0x90] sm:$0xff]   ;;  %v1936_v53 = vld [vmem:[%s2446_s4 + $0x58] sm:$0xff]   ;;  %v1939_v56 = vld [vmem:[%s2446_s4 + $0x60] sm:$0xff]  }
  0x13   : > { %1717 = vmatpush3.bf16.msra.mxu0 %v1912_v11  ;;  %v458_v34 = vrot.slane %v456_v28, 7  ;;  %v477_v37 = vrot.slane %v459_v29, 1  ;;  %v1937_v54 = vld [vmem:[%s2446_s4 + $0x18] sm:$0xff]   ;;  %v1940_v57 = vld [vmem:[%s2446_s4 + $0x20] sm:$0xff]   ;;  %v1942_v59 = vld [vmem:[%s2446_s4 + $0x68] sm:$0xff]  }
  0x14   : > { %1819 = vmatpush3.bf16.msra.mxu1 %v1913_v12  ;;  %1718 = vmatprep.subr.bf16.mxu0 %v1914_v13  ;;  %v1938_v55 = vld [vmem:[%s2446_s4 + $0x98] sm:$0xff]   ;;  %v1941_v58 = vld [vmem:[%s2446_s4 + $0xa0] sm:$0xff]   ;;  %v1943_v60 = vld [vmem:[%s2446_s4 + $0x28] sm:$0xff]  }
  0x15   : > { %1820 = vmatprep.subr.bf16.mxu1 %v1991_v1  ;;  %v461_v39 = vor.u32 %v459_v29, %v458_v34  ;;  %v478_v40 = vor.u32 %v477_v37, %v456_v28  ;;  %v466_v41 = vld [vmem:[#allocation2] sm:$0xff]  ;;  %v1944_v61 = vld [vmem:[%s2446_s4 + $0xa8] sm:$0xff]   ;;  %v783_v62 = vld [vmem:[#allocation3] sm:$0x1] }
  0x16   : > { %v798_v63 = vld [vmem:[#allocation3 + $0x10] sm:$0x80]  ;;  %v784_v0 = vsel %vm2166_vm6, 0, %v783_v62  ;;  %v1945_v3 = vld [vmem:[%s2446_s4 + $0x70] sm:$0xff]   ;;  %v1948_v6 = vld [vmem:[%s2446_s4 + $0x78] sm:$0xff]  }
  0x17   : > { %1719 = vmatpush3.bf16.msra.mxu0 %v1915_v14  ;;  %v467_v42 = vsel %vm2175_vm8, %v461_v39, %v466_v41  ;;  %v482_v43 = vld [vmem:[#allocation2 + $0x10] sm:$0xff]  ;;  %v799_v2 = vsel %vm2183_vm10, 0, %v798_v63  ;;  %785 = vst [vmem:[#allocation3] sm:$0x1] %v784_v0  ;;  %v1949_v7 = vld [vmem:[%s2446_s4 + $0x38] sm:$0xff]   ;;  %v1951_v9 = vld [vmem:[%s2449_s7 + $0x40] sm:$0xff]  }
  0x18   : > { %1821 = vmatpush3.bf16.msra.mxu1 %v1916_v15  ;;  %1720 = vmatprep.subr.bf16.mxu0 %v1917_v16  ;;  %468 = vst [vmem:[#allocation2] sm:$0xff] %v467_v42  ;;  %v483_v44 = vsel %vm2191_vm11, %v478_v40, %v482_v43  ;;  %800 = vst [vmem:[#allocation3 + $0x10] sm:$0x80] %v799_v2  ;;  %v1946_v4 = vld [vmem:[%s2446_s4 + $0x30] sm:$0xff]   ;;  %v1950_v8 = vld [vmem:[%s2446_s4 + $0xb8] sm:$0xff]  }
  0x19   : > { %1822 = vmatprep.subr.bf16.mxu1 %v1991_v1  ;;  %484 = vst [vmem:[#allocation2 + $0x10] sm:$0xff] %v483_v44  ;;  %v1947_v5 = vld [vmem:[%s2446_s4 + $0xb0] sm:$0xff]   ;;  %v1642_v15 = vld [vmem:[%s2444_s2] ss:$0 sm:$0xff]  ;;  %v1968_v62 = vld [vmem:[%s2449_s7 + $0xa8] sm:$0xff]  }
  0x1a   : > { %v1105_v63 = vld [vmem:[#allocation4] sm:$0x1]  ;;  %v1120_v0 = vld [vmem:[#allocation4 + $0x10] sm:$0x80]  ;;  %v1972_v27 = vld [vmem:[%s2449_s7 + $0x78] sm:$0xff]  }
  0x1b   : > { %1721 = vmatpush3.bf16.msra.mxu0 %v1918_v17  ;;  %v1969_v2 = vld [vmem:[%s2449_s7 + $0x70] sm:$0xff]   ;;  %v1973_v35 = vld [vmem:[%s2449_s7 + $0x38] sm:$0xff]  }
  0x1c   : > { %1823 = vmatpush3.bf16.msra.mxu1 %v1919_v18  ;;  %1722 = vmatprep.subr.bf16.mxu0 %v1920_v19  ;;  %v1977_v32 = vld [vmem:[%s2452_s10 + $0x10] sm:$0xff]   ;;  %v1978_v38 = vld [vmem:[%s2452_s10 + $0x18] sm:$0xff]  }
  0x1d   : > { %1824 = vmatprep.subr.bf16.mxu1 %v1991_v1 }
  0x1e   : > { %v794_v40 = vld [vmem:[#allocation3] sm:$0xff] }
  0x1f   : > { %1723 = vmatpush3.bf16.msra.mxu0 %v1921_v20  ;;  %v804_v41 = vld [vmem:[#allocation3 + $0x10] sm:$0xff] }
  0x20   : > { %1825 = vmatpush3.bf16.msra.mxu1 %v1922_v21  ;;  %1724 = vmatprep.subr.bf16.mxu0 %v1923_v22  ;;  %v1643_v21 = vld [vmem:[%s2445_s3] ss:$0 sm:$0xff] }
  0x21   : > { %1826 = vmatprep.subr.bf16.mxu1 %v1991_v1 }
  0x23   : > { %1725 = vmatpush3.bf16.msra.mxu0 %v1924_v24 }
  0x24   : > { %1827 = vmatpush3.bf16.msra.mxu1 %v1925_v26  ;;  %1741 = vmatprep.subr.bf16.mxu0 %v1927_v33 }
  0x25   : > { %1832 = vmatprep.subr.bf16.mxu1 %v1991_v1 }
  0x26   : > { %713 = vmatmul.mubr.bf16.vlgmr.msra.gmra.mrb[0].mxu0 %v467_v42 }
  0x27   : > { %1829 = vmatmul.mubr.bf16.vlgmr.msra.gmra.mrb[0].mxu1 %v483_v44  ;;  %1742 = vmatpush3.bf16.msra.mxu0 %v1928_v45  ;;  %v1952_v44 = vld [vmem:[%s2449_s7] sm:$0xff]  }
  0x28   : > { %1848 = vmatprep.mubr.msk.bf16.mxu1 %vm1992_vm0, %v1991_v1  ;;  %1833 = vmatpush3.bf16.msra.mxu1 %v1929_v46 }
  0x29   : > { %1834 = vmatprep.subr.bf16.mxu1 %v1991_v1  ;;  %1743 = vmatprep.subr.bf16.mxu0 %v1930_v47  ;;  %v1953_v47 = vld [vmem:[%s2449_s7 + $0x80] sm:$0xff]  }
  0x2b   : > { %1744 = vmatpush3.bf16.msra.mxu0 %v1931_v48  ;;  %v1954_v48 = vld [vmem:[%s2449_s7 + $0x48] sm:$0xff]  }
  0x2c   : > { %1835 = vmatpush3.bf16.msra.mxu1 %v1932_v49  ;;  %1745 = vmatprep.subr.bf16.mxu0 %v1933_v50  ;;  %v1955_v49 = vld [vmem:[%s2449_s7 + $0x8] sm:$0xff]  }
  0x2d   : > { %1836 = vmatprep.subr.bf16.mxu1 %v1991_v1  ;;  %v1956_v50 = vld [vmem:[%s2449_s7 + $0x88] sm:$0xff]  }
  0x2f   : > { %1746 = vmatpush3.bf16.msra.mxu0 %v1934_v51  ;;  %v1957_v51 = vld [vmem:[%s2449_s7 + $0x50] sm:$0xff]  }
  0x30   : > { %1837 = vmatpush3.bf16.msra.mxu1 %v1935_v52  ;;  %1747 = vmatprep.subr.bf16.mxu0 %v1936_v53  ;;  %v1958_v52 = vld [vmem:[%s2449_s7 + $0x10] sm:$0xff]  }
  0x31   : > { %1838 = vmatprep.subr.bf16.mxu1 %v1991_v1  ;;  %v1959_v53 = vld [vmem:[%s2449_s7 + $0x90] sm:$0xff]  }
  0x33   : > { %1748 = vmatpush3.bf16.msra.mxu0 %v1937_v54  ;;  %v1960_v54 = vld [vmem:[%s2449_s7 + $0x58] sm:$0xff]  }
  0x34   : > { %1839 = vmatpush3.bf16.msra.mxu1 %v1938_v55  ;;  %1749 = vmatprep.subr.bf16.mxu0 %v1939_v56  ;;  %v1961_v55 = vld [vmem:[%s2449_s7 + $0x18] sm:$0xff]  }
  0x35   : > { %1840 = vmatprep.subr.bf16.mxu1 %v1991_v1  ;;  %v1962_v56 = vld [vmem:[%s2449_s7 + $0x98] sm:$0xff]  }
  0x37   : > { %1750 = vmatpush3.bf16.msra.mxu0 %v1940_v57  ;;  %v1963_v57 = vld [vmem:[%s2449_s7 + $0x60] sm:$0xff]  }
  0x38   : > { %1841 = vmatpush3.bf16.msra.mxu1 %v1941_v58  ;;  %1751 = vmatprep.subr.bf16.mxu0 %v1942_v59  ;;  %v1964_v58 = vld [vmem:[%s2449_s7 + $0x20] sm:$0xff]  }
  0x39   : > { %1842 = vmatprep.subr.bf16.mxu1 %v1991_v1  ;;  %v1965_v59 = vld [vmem:[%s2449_s7 + $0xa0] sm:$0xff]  }
  0x3b   : > { %1752 = vmatpush3.bf16.msra.mxu0 %v1943_v60  ;;  %v1966_v60 = vld [vmem:[%s2449_s7 + $0x68] sm:$0xff]  }
  0x3c   : > { %1843 = vmatpush3.bf16.msra.mxu1 %v1944_v61  ;;  %1753 = vmatprep.subr.bf16.mxu0 %v1945_v3  ;;  %v1967_v61 = vld [vmem:[%s2449_s7 + $0x28] sm:$0xff]   ;;  %v1106_v3 = vsel %vm2166_vm6, 0, %v1105_v63  ;;  %v1704_v63 = vld [vmem:[%s2453_s11] ss:$0 sm:$0xff] }
  0x3d   : > { %1844 = vmatprep.subr.bf16.mxu1 %v1991_v1  ;;  %1107 = vst [vmem:[#allocation4] sm:$0x1] %v1106_v3 }
  0x3f   : > { %1754 = vmatpush3.bf16.msra.mxu0 %v1946_v4  ;;  %v1121_v4 = vsel %vm2183_vm10, 0, %v1120_v0 }
  0x40   : > { %1845 = vmatpush3.bf16.msra.mxu1 %v1947_v5  ;;  %1755 = vmatprep.subr.bf16.mxu0 %v1948_v6  ;;  %v1970_v5 = vld [vmem:[%s2449_s7 + $0x30] sm:$0xff]   ;;  %1122 = vst [vmem:[#allocation4 + $0x10] sm:$0x80] %v1121_v4 }
  0x41   : > { %1846 = vmatprep.subr.bf16.mxu1 %v1991_v1  ;;  %v1971_v6 = vld [vmem:[%s2449_s7 + $0xb0] sm:$0xff]  }
  0x43   : > { %1756 = vmatpush3.bf16.msra.mxu0 %v1949_v7  ;;  %v1974_v7 = vld [vmem:[%s2449_s7 + $0xb8] sm:$0xff]  }
  0x44   : > { %1847 = vmatpush3.bf16.msra.mxu1 %v1950_v8  ;;  %1772 = vmatprep.subr.bf16.mxu0 %v1951_v9 }
  0x45   : > { %1852 = vmatprep.subr.bf16.mxu1 %v1991_v1 }
  0xf9   : > { %v1726_v10 = vpop.f32.mrb[0].mxu0 }
  0xfa   : > { %v1727_v11 = vpop.f32.mrb[1].mxu0  ;;  %v755_v12 = vpop.f32.mrb[0].mxu1 }
  0xfb   : > { %v1728_v13 = vadd.f32 %v1727_v11, %v1726_v10  ;;  %v1729_v14 = vpop.f32.mrb[2].mxu0  ;;  %v1830_v16 = vpop.f32.mrb[1].mxu1 }
  0xfc   : > { %v1730_v17 = vpop.f32.mrb[3].mxu0  ;;  %v758_v19 = vpop.f32.mrb[2].mxu1 }
  0xfd   : > { %v756_v18 = vadd.f32 %v1728_v13, %v755_v12  ;;  %v1731_v20 = vadd.f32 %v1730_v17, %v1729_v14  ;;  %v1831_v22 = vpop.f32.mrb[3].mxu1 }
  0xff   : > { %v769_v24 = vmul.f32 %v1642_v15, %v756_v18  ;;  %v759_v25 = vadd.f32 %v1731_v20, %v758_v19  ;;  %v1669_v20 = vld [vmem:[%s2448_s6] ss:$0 sm:$0xff] }
 0x101   : > { %v778_v26 = vadd.f32 %v1643_v21, %v769_v24  ;;  %v770_v28 = vmul.f32 %v1642_v15, %v759_v25  ;;  %v1668_v15 = vld [vmem:[%s2447_s5] ss:$0 sm:$0xff] }
 0x103   : > { %v779_v29 = vadd.f32 %v1643_v21, %v770_v28  ;;  %v780_v30 = vmax.f32 %v778_v26, 0.0 }
 0x105   : > { %v781_v31 = vmax.f32 %v779_v29, 0.0 }
 0x107   : > { %v782_v33 = vpack.c.bf16 %v781_v31, %v780_v30 }
 0x109   : > { %v787_v34 = vshrl.u32 %v782_v33, 16  ;;  %v790_v36 = vshll.u32 %v782_v33, 16  ;;  %1034 = vmatprep.mubr.bf16.mxu0 %v782_v33 }
 0x10b   : > { %v789_v37 = vrot.slane %v787_v34, 7  ;;  %v801_v39 = vrot.slane %v790_v36, 1 }
 0x10d   : > { %v792_v42 = vor.u32 %v790_v36, %v789_v37  ;;  %v802_v43 = vor.u32 %v801_v39, %v787_v34  ;;  %v1116_v37 = vld [vmem:[#allocation4] sm:$0xff]  ;;  %v1126_v39 = vld [vmem:[#allocation4 + $0x10] sm:$0xff] }
 0x10f   : > { %v795_v45 = vsel %vm2175_vm8, %v792_v42, %v794_v40  ;;  %v805_v46 = vsel %vm2191_vm11, %v802_v43, %v804_v41  ;;  %v1975_v42 = vld [vmem:[%s2452_s10] sm:$0xff]  }
 0x110   : > { %796 = vst [vmem:[#allocation3] sm:$0xff] %v795_v45  ;;  %806 = vst [vmem:[#allocation3 + $0x10] sm:$0xff] %v805_v46  ;;  %1035 = vmatmul.mubr.bf16.vlgmr.msra.gmra.mrb[4].mxu0 %v795_v45  ;;  %1849 = vmatmul.mubr.bf16.vlgmr.msra.gmra.mrb[4].mxu1 %v805_v46  ;;  %v1976_v45 = vld [vmem:[%s2452_s10 + $0x8] sm:$0xff]   ;;  %v1979_v46 = vld [vmem:[%s2452_s10 + $0x20] sm:$0xff]  }
 0x111   : > { %1773 = vmatpush3.bf16.msra.mxu0 %v1952_v44  ;;  %1868 = vmatprep.mubr.msk.bf16.mxu1 %vm1992_vm0, %v1991_v1 }
 0x112   : > { %1853 = vmatpush3.bf16.msra.mxu1 %v1953_v47  ;;  %1774 = vmatprep.subr.bf16.mxu0 %v1954_v48  ;;  %v1980_v47 = vld [vmem:[%s2452_s10 + $0x28] sm:$0xff]   ;;  %v1981_v48 = vld [vmem:[%s2452_s10 + $0x30] sm:$0xff]  }
 0x113   : > { %1854 = vmatprep.subr.bf16.mxu1 %v1991_v1 }
 0x115   : > { %1775 = vmatpush3.bf16.msra.mxu0 %v1955_v49  ;;  %v1982_v49 = vld [vmem:[%s2452_s10 + $0x38] sm:$0xff]  }
 0x116   : > { %1855 = vmatpush3.bf16.msra.mxu1 %v1956_v50  ;;  %1776 = vmatprep.subr.bf16.mxu0 %v1957_v51 }
 0x117   : > { %1856 = vmatprep.subr.bf16.mxu1 %v1991_v1 }
 0x119   : > { %1777 = vmatpush3.bf16.msra.mxu0 %v1958_v52 }
 0x11a   : > { %1857 = vmatpush3.bf16.msra.mxu1 %v1959_v53  ;;  %1778 = vmatprep.subr.bf16.mxu0 %v1960_v54 }
 0x11b   : > { %1858 = vmatprep.subr.bf16.mxu1 %v1991_v1 }
 0x11d   : > { %1779 = vmatpush3.bf16.msra.mxu0 %v1961_v55 }
 0x11e   : > { %1859 = vmatpush3.bf16.msra.mxu1 %v1962_v56  ;;  %1780 = vmatprep.subr.bf16.mxu0 %v1963_v57 }
 0x11f   : > { %1860 = vmatprep.subr.bf16.mxu1 %v1991_v1 }
 0x121   : > { %1781 = vmatpush3.bf16.msra.mxu0 %v1964_v58 }
 0x122   : > { %1861 = vmatpush3.bf16.msra.mxu1 %v1965_v59  ;;  %1782 = vmatprep.subr.bf16.mxu0 %v1966_v60 }
 0x123   : > { %1862 = vmatprep.subr.bf16.mxu1 %v1991_v1 }
 0x125   : > { %1783 = vmatpush3.bf16.msra.mxu0 %v1967_v61 }
 0x126   : > { %1863 = vmatpush3.bf16.msra.mxu1 %v1968_v62  ;;  %1784 = vmatprep.subr.bf16.mxu0 %v1969_v2 }
 0x127   : > { %1864 = vmatprep.subr.bf16.mxu1 %v1991_v1 }
 0x129   : > { %1785 = vmatpush3.bf16.msra.mxu0 %v1970_v5 }
 0x12a   : > { %1865 = vmatpush3.bf16.msra.mxu1 %v1971_v6  ;;  %1786 = vmatprep.subr.bf16.mxu0 %v1972_v27  ;;  %v1705_v6 = vld [vmem:[%s2454_s12] ss:$0 sm:$0xff] }
 0x12b   : > { %1866 = vmatprep.subr.bf16.mxu1 %v1991_v1 }
 0x12d   : > { %1787 = vmatpush3.bf16.msra.mxu0 %v1973_v35 }
 0x12e   : > { %1867 = vmatpush3.bf16.msra.mxu1 %v1974_v7  ;;  %1872 = vmatprep.subr.bf16.mxu0 %v1991_v1 }
 0x1e3   : > { %v1757_v8 = vpop.f32.mrb[4].mxu0  ;;  %v1077_v9 = vpop.f32.mrb[4].mxu1 }
 0x1e4   : > { %v1758_v10 = vpop.f32.mrb[5].mxu0  ;;  %v1850_v11 = vpop.f32.mrb[5].mxu1 }
 0x1e5   : > { %v1759_v12 = vadd.f32 %v1758_v10, %v1757_v8  ;;  %v1760_v13 = vpop.f32.mrb[6].mxu0  ;;  %v1080_v14 = vpop.f32.mrb[6].mxu1 }
 0x1e6   : > { %v1761_v16 = vpop.f32.mrb[7].mxu0  ;;  %v1851_v17 = vpop.f32.mrb[7].mxu1 }
 0x1e7   : > { %v1078_v18 = vadd.f32 %v1759_v12, %v1077_v9  ;;  %v1762_v19 = vadd.f32 %v1761_v16, %v1760_v13 }
 0x1e9   : > { %v1091_v21 = vmul.f32 %v1668_v15, %v1078_v18  ;;  %v1081_v22 = vadd.f32 %v1762_v19, %v1080_v14 }
 0x1eb   : > { %v1100_v24 = vadd.f32 %v1669_v20, %v1091_v21  ;;  %v1092_v25 = vmul.f32 %v1668_v15, %v1081_v22 }
 0x1ed   : > { %v1101_v26 = vadd.f32 %v1669_v20, %v1092_v25  ;;  %v1102_v28 = vmax.f32 %v1100_v24, 0.0 }
 0x1ef   : > { %v1103_v29 = vmax.f32 %v1101_v26, 0.0 }
 0x1f1   : > { %v1104_v30 = vpack.c.bf16 %v1103_v29, %v1102_v28 }
 0x1f3   : > { %v1109_v31 = vshrl.u32 %v1104_v30, 16  ;;  %v1112_v33 = vshll.u32 %v1104_v30, 16  ;;  %1356 = vmatprep.mubr.bf16.mxu0 %v1104_v30 }
 0x1f5   : > { %v1111_v34 = vrot.slane %v1109_v31, 7  ;;  %v1123_v36 = vrot.slane %v1112_v33, 1 }
 0x1f7   : > { %v1114_v40 = vor.u32 %v1112_v33, %v1111_v34  ;;  %v1124_v41 = vor.u32 %v1123_v36, %v1109_v31 }
 0x1f9   : > { %v1117_v43 = vsel %vm2175_vm8, %v1114_v40, %v1116_v37  ;;  %v1127_v44 = vsel %vm2191_vm11, %v1124_v41, %v1126_v39 }
 0x1fa   : > { %1118 = vst [vmem:[#allocation4] sm:$0xff] %v1117_v43  ;;  %1128 = vst [vmem:[#allocation4 + $0x10] sm:$0xff] %v1127_v44  ;;  %1357 = vmatmul.mubr.bf16.vlgmr.msra.gmra.mrb[8].mxu0 %v1117_v43  ;;  %1869 = vmatmul.mubr.bf16.vlgmr.msra.gmra.mrb[8].mxu1 %v1127_v44 }
 0x1fb   : > { %1873 = vmatpush3.bf16.msra.mxu0 %v1975_v42  ;;  %1888 = vmatprep.mubr.msk.bf16.mxu0 %vm1992_vm0, %v1991_v1 }
 0x1fc   : > { %1874 = vmatprep.subr.bf16.mxu0 %v1991_v1 }
 0x1ff   : > { %1875 = vmatpush3.bf16.msra.mxu0 %v1976_v45 }
 0x200   : > { %1876 = vmatprep.subr.bf16.mxu0 %v1991_v1 }
 0x203   : > { %1877 = vmatpush3.bf16.msra.mxu0 %v1977_v32 }
 0x204   : > { %1878 = vmatprep.subr.bf16.mxu0 %v1991_v1 }
 0x207   : > { %1879 = vmatpush3.bf16.msra.mxu0 %v1978_v38 }
 0x208   : > { %1880 = vmatprep.subr.bf16.mxu0 %v1991_v1 }
 0x20b   : > { %1881 = vmatpush3.bf16.msra.mxu0 %v1979_v46 }
 0x20c   : > { %1882 = vmatprep.subr.bf16.mxu0 %v1991_v1 }
 0x20f   : > { %1883 = vmatpush3.bf16.msra.mxu0 %v1980_v47 }
 0x210   : > { %1884 = vmatprep.subr.bf16.mxu0 %v1991_v1 }
 0x213   : > { %1885 = vmatpush3.bf16.msra.mxu0 %v1981_v48 }
 0x214   : > { %1886 = vmatprep.subr.bf16.mxu0 %v1991_v1  ;;  %v1694_v1 = vld [vmem:[%s2450_s8] ss:$0 sm:$0xff] }
 0x217   : > { %1887 = vmatpush3.bf16.msra.mxu0 %v1982_v49 }
 0x21a   : > { %1889 = vmatmul.mubr.bf16.vlgmr.msra.gmra.mrb[12].mxu0 %v2155_v23  ;;  %v1695_v23 = vld [vmem:[%s2451_s9] ss:$0 sm:$0xff] }
 0x2cd   : > { %v1788_v50 = vpop.f32.mrb[8].mxu0  ;;  %v1399_v51 = vpop.f32.mrb[8].mxu1 }
 0x2ce   : > { %v1789_v52 = vpop.f32.mrb[9].mxu0  ;;  %v1870_v53 = vpop.f32.mrb[9].mxu1 }
 0x2cf   : > { %v1790_v54 = vadd.f32 %v1789_v52, %v1788_v50  ;;  %v1791_v55 = vpop.f32.mrb[10].mxu0  ;;  %v1402_v56 = vpop.f32.mrb[10].mxu1 }
 0x2d0   : > { %v1792_v57 = vpop.f32.mrb[11].mxu0  ;;  %v1871_v58 = vpop.f32.mrb[11].mxu1 }
 0x2d1   : > { %v1400_v59 = vadd.f32 %v1790_v54, %v1399_v51  ;;  %v1793_v60 = vadd.f32 %v1792_v57, %v1791_v55 }
 0x2d3   : > { %v1403_v61 = vadd.f32 %v1793_v60, %v1402_v56  ;;  %v1413_v62 = vmul.f32 %v1694_v1, %v1400_v59 }
 0x2d5   : > { %v1414_v0 = vmul.f32 %v1694_v1, %v1403_v61  ;;  %v1422_v3 = vadd.f32 %v1695_v23, %v1413_v62 }
 0x2d7   : > { %v1423_v7 = vadd.f32 %v1695_v23, %v1414_v0 }
 0x2ed   : > { %v1522_v2 = vpop.f32.mrb[12].mxu0 }
 0x2ee   : > { %v1536_v4 = vmul.f32 %v1704_v63, %v1522_v2  ;;  %v1890_v5 = vpop.f32.mrb[13].mxu0 }
 0x2ef   : > { %v1525_v27 = vpop.f32.mrb[14].mxu0 }
 0x2f0   : > { %v1538_v35 = vadd.f32 %v1536_v4, %v1422_v3  ;;  %v1537_v8 = vmul.f32 %v1704_v63, %v1525_v27  ;;  %v1891_v9 = vpop.f32.mrb[15].mxu0 }
 0x2f2   : > { %v1547_v10 = vadd.f32 %v1705_v6, %v1538_v35  ;;  %v1539_v11 = vadd.f32 %v1537_v8, %v1423_v7 }
 0x2f4   : > { %v1549_v12 = vmax.f32 %v1547_v10, 0.0  ;;  %v1548_v13 = vadd.f32 %v1705_v6, %v1539_v11 }
 0x2f6   : > { %1551 = vst [vmem:[%s440_s30] sm:$0xff] %v1549_v12  ;;  %v1550_v14 = vmax.f32 %v1548_v13, 0.0 }
 0x2f8   : > { %1552 = vst [vmem:[%s440_s30 + $0x8] sm:$0xff] %v1550_v14 }
 0x2f9 PF: > { %s23_s25 = sadd.s32 1, %s1989_s25  }
 0x2fa   : > { %p20_p4 = scmp.ge.s32.totalorder %s23_s25, 4  }
 0x2fc   :  { %22 = sbr.rel (!%p20_p4) target bundleno = 1 (0x1), region = 102 }

</bundles_post_ra>
